<compile_context>
chip_gen: v7x
topology: tpu7x:2x2x1
jax: 0.10.0
libtpu: 0.0.40
codegen_flags: <defaults>
</compile_context>

<pallas_src>
import functools

import jax
import jax.numpy as jnp
from jax import lax
from jax.experimental import pallas as pl
from jax.experimental.pallas import tpu as pltpu


def _round_up(v, m):
    return (v + m - 1) // m * m


def _mmd_tile_kernel(bi_ref, bj_ref, zr_ref, zc_ref, ar_ref, ac_ref, out_ref, *,
                     tile, n_x, n_y, s, n_kernels, use_squaring, ratios):
    """One upper-triangular (tile x tile) block of the pair space.

    bi_ref/bj_ref : SMEM int32 [n_steps]  row/col block indices (prefetched).
    zr_ref        : VMEM [T, Dp]  row block of Z, pre-scaled by sqrt(-2*coef0).
    zc_ref        : VMEM [T, Dp]  col block of Z (same array).
    ar_ref        : VMEM [T, 1]   coef0 * ||z_i||^2 for the row block.
    ac_ref        : VMEM [1, T]   coef0 * ||z_j||^2 for the col block.
    out_ref       : VMEM [8, 128] scalar accumulator (resident across grid).
    """
    t = pl.program_id(0)
    bi = bi_ref[t]
    bj = bj_ref[t]

    @pl.when(t == 0)
    def _init():
        out_ref[...] = jnp.zeros_like(out_ref)

    zr = zr_ref[...]                                     # [T, Dp] f32
    zc = zc_ref[...]                                     # [T, Dp] f32

    # gram[i,j] = -2*coef0*<z_i, z_j>  (MXU, contracting the feature dim).
    gram = lax.dot_general(zr, zc, (((1,), (1,)), ((), ())),
                           preferred_element_type=jnp.float32)   # [T, T]

    # arg = coef0 * ||z_i - z_j||^2 <= 0 ; the max(l2, 0) clamp becomes min(.,0).
    arg = jnp.minimum(ar_ref[...] + ac_ref[...] + gram, 0.0)     # [T, T]

    base = jnp.exp(arg)                  # single EUP exp per tile element
    ksum = base
    if use_squaring:
        # mul_factor == 2 -> remaining bandwidths by repeated VPU squaring.
        b = base
        for _ in range(n_kernels - 1):
            b = b * b                    # exp(arg * 2^k)
            ksum = ksum + b
    else:
        # generic fallback: static coefficient ratios, still one mul + exp each.
        for k in range(1, n_kernels):
            ksum = ksum + jnp.exp(arg * ratios[k])

    # Weight vectors built in-kernel (no lane-sparse DMAs):
    #   c_i = +1/n_x for X rows, -1/n_y for Y rows, 0 for padding rows.
    ri = bi * tile + lax.broadcasted_iota(jnp.int32, (tile, 1), 0)   # [T, 1]
    cj = bj * tile + lax.broadcasted_iota(jnp.int32, (1, tile), 1)   # [1, T]
    inv_nx = jnp.float32(1.0 / n_x)
    neg_inv_ny = jnp.float32(-1.0 / n_y)
    zero = jnp.float32(0.0)
    cr = jnp.where(ri < n_x, inv_nx, jnp.where(ri < s, neg_inv_ny, zero))
    cc = jnp.where(cj < n_x, inv_nx, jnp.where(cj < s, neg_inv_ny, zero))

    # Column-weighted row reduction on the MXU: v_i = sum_j K_ij * c_j.
    v = lax.dot_general(ksum, cc, (((1,), (1,)), ((), ())),
                        preferred_element_type=jnp.float32)          # [T, 1]
    partial = jnp.sum(v * cr)                                        # scalar

    # Off-diagonal tile pairs counted twice (symmetry of K and of c).
    w = jnp.where(bi == bj, jnp.float32(1.0), jnp.float32(2.0))
    out_ref[...] += w * partial


def mmd_loss(x, y, n_kernels=5, mul_factor=2.0, bandwidth=None, block=256):
    """MMD loss between X [N, D] and Y [M, D] with a multi-bandwidth RBF kernel."""
    x = jnp.asarray(x, jnp.float32)
    y = jnp.asarray(y, jnp.float32)
    n_x, d = x.shape
    n_y = y.shape[0]
    s = n_x + n_y

    z = jnp.concatenate([x, y], axis=0)                       # [s, d]

    # ---- bandwidth (RBF.get_bandwidth): sum_{ij}||z_i-z_j||^2 / (s^2 - s) ----
    # Mean-centered identity avoids f32 cancellation for data with big offsets.
    if bandwidth is None:
        zc0 = z - jnp.mean(z, axis=0, keepdims=True)
        sum_l2 = 2.0 * s * jnp.sum(zc0 * zc0)
        bw = sum_l2 / float(s * s - s)
    else:
        bw = jnp.float32(bandwidth)

    # Deterministic multipliers from RBF.__init__: mul_factor^(arange(n)-n//2).
    mults = [float(mul_factor) ** (i - n_kernels // 2) for i in range(n_kernels)]
    m_desc = sorted(mults, reverse=True)                       # static floats
    coef0 = -1.0 / (bw * m_desc[0])                            # smallest |coef|
    ratios = tuple(m_desc[0] / m for m in m_desc)              # coef_k / coef0 (static)
    use_squaring = (float(mul_factor) == 2.0) and n_kernels > 1

    # ---- pre-scaling (review item 3): fold coef0 into the inputs -------------
    norms = jnp.sum(z * z, axis=1)                             # [s]
    a_vals = (coef0 * norms).astype(jnp.float32)               # coef0 * ||z_i||^2
    z_scaled = (z * jnp.sqrt(-2.0 * coef0)).astype(jnp.float32)

    # ---- tiling of the pair space --------------------------------------------
    d_pad = _round_up(d, 128)                                  # lane-dense features
    tile = block if s >= block else _round_up(s, 8)
    # keep double-buffered zr+zc within ~24 MiB of VMEM (v7x-safe).
    while tile > 128 and 4 * tile * d_pad * 4 > 24 * 1024 * 1024:
        tile //= 2
    s_pad = _round_up(s, tile)
    g = s_pad // tile

    z_p = jnp.pad(z_scaled, ((0, s_pad - s), (0, d_pad - d)))  # [s_pad, d_pad]
    a_p = jnp.pad(a_vals, (0, s_pad - s))
    a_row = a_p.reshape(s_pad, 1)
    a_col = a_p.reshape(1, s_pad)

    # Upper-triangular block schedule; row block resident per triangle row.
    bi_list, bj_list = [], []
    for i in range(g):
        for j in range(i, g):
            bi_list.append(i)
            bj_list.append(j)
    n_steps = len(bi_list)
    bi_arr = jnp.asarray(bi_list, jnp.int32)
    bj_arr = jnp.asarray(bj_list, jnp.int32)

    kernel = functools.partial(
        _mmd_tile_kernel, tile=tile, n_x=n_x, n_y=n_y, s=s,
        n_kernels=n_kernels, use_squaring=use_squaring, ratios=ratios)

    exps_per_elem = 1 if use_squaring else n_kernels
    cost = pl.CostEstimate(
        flops=int(n_steps * (2 * tile * tile * d_pad + 12 * tile * tile)),
        transcendentals=int(n_steps * tile * tile * exps_per_elem),
        bytes_accessed=int((g + n_steps) * tile * d_pad * 4),
    )

    vmem_need = 4 * tile * d_pad * 4 + 4 * tile * tile * 4 + (1 << 20)
    vmem_limit = int(min(max(2 * vmem_need, 32 * 1024 * 1024), 64 * 1024 * 1024))

    out = pl.pallas_call(
        kernel,
        out_shape=jax.ShapeDtypeStruct((8, 128), jnp.float32),
        grid_spec=pltpu.PrefetchScalarGridSpec(
            num_scalar_prefetch=2,
            grid=(n_steps,),
            in_specs=[
                pl.BlockSpec((tile, d_pad), lambda t, bi, bj: (bi[t], 0)),  # Z row blk
                pl.BlockSpec((tile, d_pad), lambda t, bi, bj: (bj[t], 0)),  # Z col blk
                pl.BlockSpec((tile, 1), lambda t, bi, bj: (bi[t], 0)),      # a row blk
                pl.BlockSpec((1, tile), lambda t, bi, bj: (0, bj[t])),      # a col blk
            ],
            out_specs=pl.BlockSpec((8, 128), lambda t, bi, bj: (0, 0)),
        ),
        compiler_params=pltpu.CompilerParams(
            dimension_semantics=("arbitrary",),
            vmem_limit_bytes=vmem_limit),
        cost_estimate=cost,
    )(bi_arr, bj_arr, z_p, z_p, a_row, a_col)

    # The (8,128) accumulator holds the same broadcast scalar everywhere.
    return out[0, 0]


def _mmd_loss_ref(x, y, n_kernels=5, mul_factor=2.0):
    """Pure-JAX reference mirroring the PyTorch module."""
    mults = jnp.asarray(
        [float(mul_factor) ** (i - n_kernels // 2) for i in range(n_kernels)],
        dtype=jnp.float32,
    )
    z = jnp.concatenate([x, y], axis=0).astype(jnp.float32)
    s = z.shape[0]
    diff = z[:, None, :] - z[None, :, :]
    l2 = jnp.sum(diff * diff, axis=-1)
    bw = jnp.sum(l2) / (s * s - s)
    k = jnp.sum(jnp.exp(-l2[None, ...] / (bw * mults)[:, None, None]), axis=0)
    n = x.shape[0]
    return (
        jnp.mean(k[:n, :n]) - 2.0 * jnp.mean(k[:n, n:]) + jnp.mean(k[n:, n:])
    )


if __name__ == "__main__":
    key = jax.random.PRNGKey(0)
    kx, ky = jax.random.split(key)
    N, M, D = 8, 8, 32
    X = jax.random.normal(kx, (N, D), dtype=jnp.float32)
    Y = jax.random.normal(ky, (M, D), dtype=jnp.float32) + 0.5

    loss = jax.block_until_ready(mmd_loss(X, Y))
    ref = jax.block_until_ready(_mmd_loss_ref(X, Y))

    assert jnp.isfinite(loss), "non-finite loss"
    assert jnp.allclose(loss, ref, rtol=5e-4, atol=1e-5), (loss, ref)
    print("KERNEL_OK")
</pallas_src>

<mosaic_0001>
module attributes {stable_mosaic.version = 11 : i64} {
  func.func @_mmd_tile_kernel(%arg0: i32, %arg1: memref<1xi32, #tpu.memory_space<smem>>, %arg2: memref<1xi32, #tpu.memory_space<smem>>, %arg3: memref<16x128xf32, #tpu.memory_space<vmem>>, %arg4: memref<16x128xf32, #tpu.memory_space<vmem>>, %arg5: memref<16x1xf32, #tpu.memory_space<vmem>>, %arg6: memref<1x16xf32, #tpu.memory_space<vmem>>, %arg7: memref<8x128xf32, #tpu.memory_space<vmem>>) attributes {dimension_semantics = [#tpu.dimension_semantics<arbitrary>], iteration_bounds = array<i64: 1>, scalar_prefetch = 2 : i64, scratch_operands = 0 : i64, tpu.core_type = #tpu.core_type<tc>, window_params = [{transform_indices = @transform_0, window_bounds = array<i64: 16, 128>}, {transform_indices = @transform_1, window_bounds = array<i64: 16, 128>}, {transform_indices = @transform_2, window_bounds = array<i64: 16, 1>}, {transform_indices = @transform_3, window_bounds = array<i64: 1, 16>}, {pipeline_mode = #tpu.pipeline_mode<synchronous>, transform_indices = @transform_4, window_bounds = array<i64: 8, 128>}]} {
    %0 = arith.index_cast %arg0 : i32 to index
    %1 = memref.load %arg1[%0] : memref<1xi32, #tpu.memory_space<smem>>
    %2 = arith.index_cast %arg0 : i32 to index
    %3 = memref.load %arg2[%2] : memref<1xi32, #tpu.memory_space<smem>>
    %c0_i32 = arith.constant 0 : i32
    %4 = arith.cmpi eq, %arg0, %c0_i32 : i32
    %5 = arith.extui %4 : i1 to i32
    %c0_i32_0 = arith.constant 0 : i32
    %6 = arith.cmpi ne, %5, %c0_i32_0 : i32
    scf.if %6 {
      %cst_27 = arith.constant 0.000000e+00 : f32
      %66 = vector.broadcast %cst_27 : f32 to vector<8x128xf32>
      %c0_28 = arith.constant 0 : index
      %c0_29 = arith.constant 0 : index
      %67 = vector.load %arg7[%c0_28, %c0_29] : memref<8x128xf32, #tpu.memory_space<vmem>>, vector<8x128xf32>
      tpu.vector_store %arg7[%c0_28, %c0_29], %66 {strides = array<i32>} : memref<8x128xf32, #tpu.memory_space<vmem>>, vector<8x128xf32>,
    } else {
    }
    %c0 = arith.constant 0 : index
    %c0_1 = arith.constant 0 : index
    %7 = vector.load %arg3[%c0, %c0_1] : memref<16x128xf32, #tpu.memory_space<vmem>>, vector<16x128xf32>
    %c0_2 = arith.constant 0 : index
    %c0_3 = arith.constant 0 : index
    %8 = vector.load %arg4[%c0_2, %c0_3] : memref<16x128xf32, #tpu.memory_space<vmem>>, vector<16x128xf32>
    %cst = arith.constant dense<0.000000e+00> : vector<16x16xf32>
    %9 = tpu.matmul %7, %8, %cst {dimension_numbers = #tpu.dot_dimension_numbers<[1], [1], [0], [0], [0, 0, 1, 0], [], []>} : vector<16x128xf32>, vector<16x128xf32>, vector<16x16xf32> -> vector<16x16xf32>
    %c0_4 = arith.constant 0 : index
    %c0_5 = arith.constant 0 : index
    %10 = vector.load %arg5[%c0_4, %c0_5] : memref<16x1xf32, #tpu.memory_space<vmem>>, vector<16x1xf32>
    %c0_6 = arith.constant 0 : index
    %c0_7 = arith.constant 0 : index
    %11 = vector.load %arg6[%c0_6, %c0_7] : memref<1x16xf32, #tpu.memory_space<vmem>>, vector<1x16xf32>
    %12 = vector.broadcast %10 : vector<16x1xf32> to vector<16x16xf32>
    %13 = vector.broadcast %11 : vector<1x16xf32> to vector<16x16xf32>
    %14 = arith.addf %12, %13 : vector<16x16xf32>
    %15 = arith.addf %14, %9 : vector<16x16xf32>
    %cst_8 = arith.constant 0.000000e+00 : f32
    %16 = vector.broadcast %cst_8 : f32 to vector<16x16xf32>
    %17 = arith.minimumf %15, %16 : vector<16x16xf32>
    %18 = math.exp %17 : vector<16x16xf32>
    %19 = arith.mulf %18, %18 : vector<16x16xf32>
    %20 = arith.addf %18, %19 : vector<16x16xf32>
    %21 = arith.mulf %19, %19 : vector<16x16xf32>
    %22 = arith.addf %20, %21 : vector<16x16xf32>
    %23 = arith.mulf %21, %21 : vector<16x16xf32>
    %24 = arith.addf %22, %23 : vector<16x16xf32>
    %25 = arith.mulf %23, %23 : vector<16x16xf32>
    %26 = arith.addf %24, %25 : vector<16x16xf32>
    %c16_i32 = arith.constant 16 : i32
    %27 = arith.muli %1, %c16_i32 : i32
    %28 = tpu.iota {dimensions = array<i32: 0>} : vector<16x1xi32>
    %29 = vector.broadcast %27 : i32 to vector<16x1xi32>
    %30 = arith.addi %29, %28 : vector<16x1xi32>
    %c16_i32_9 = arith.constant 16 : i32
    %31 = arith.muli %3, %c16_i32_9 : i32
    %32 = tpu.iota {dimensions = array<i32: 1>} : vector<1x16xi32>
    %33 = vector.broadcast %31 : i32 to vector<1x16xi32>
    %34 = arith.addi %33, %32 : vector<1x16xi32>
    %c8_i32 = arith.constant 8 : i32
    %35 = vector.broadcast %c8_i32 : i32 to vector<16x1xi32>
    %36 = arith.cmpi slt, %30, %35 : vector<16x1xi32>
    %c16_i32_10 = arith.constant 16 : i32
    %37 = vector.broadcast %c16_i32_10 : i32 to vector<16x1xi32>
    %38 = arith.cmpi slt, %30, %37 : vector<16x1xi32>
    %cst_11 = arith.constant -1.250000e-01 : f32
    %cst_12 = arith.constant 0.000000e+00 : f32
    %39 = vector.broadcast %cst_11 : f32 to vector<16x1xf32>
    %40 = vector.broadcast %cst_12 : f32 to vector<16x1xf32>
    %41 = arith.select %38, %39, %40 : vector<16x1xi1>, vector<16x1xf32>
    %cst_13 = arith.constant 1.250000e-01 : f32
    %42 = vector.broadcast %cst_13 : f32 to vector<16x1xf32>
    %43 = arith.select %36, %42, %41 : vector<16x1xi1>, vector<16x1xf32>
    %c8_i32_14 = arith.constant 8 : i32
    %44 = vector.broadcast %c8_i32_14 : i32 to vector<1x16xi32>
    %45 = arith.cmpi slt, %34, %44 : vector<1x16xi32>
    %c16_i32_15 = arith.constant 16 : i32
    %46 = vector.broadcast %c16_i32_15 : i32 to vector<1x16xi32>
    %47 = arith.cmpi slt, %34, %46 : vector<1x16xi32>
    %cst_16 = arith.constant -1.250000e-01 : f32
    %cst_17 = arith.constant 0.000000e+00 : f32
    %48 = vector.broadcast %cst_16 : f32 to vector<1x16xf32>
    %49 = vector.broadcast %cst_17 : f32 to vector<1x16xf32>
    %50 = arith.select %47, %48, %49 : vector<1x16xi1>, vector<1x16xf32>
    %cst_18 = arith.constant 1.250000e-01 : f32
    %51 = vector.broadcast %cst_18 : f32 to vector<1x16xf32>
    %52 = arith.select %45, %51, %50 : vector<1x16xi1>, vector<1x16xf32>
    %cst_19 = arith.constant dense<0.000000e+00> : vector<16x1xf32>
    %53 = tpu.matmul %26, %52, %cst_19 {dimension_numbers = #tpu.dot_dimension_numbers<[1], [1], [0], [0], [0, 0, 1, 0], [], []>} : vector<16x16xf32>, vector<1x16xf32>, vector<16x1xf32> -> vector<16x1xf32>
    %54 = arith.mulf %53, %43 : vector<16x1xf32>
    %55 = vector.shape_cast %54 : vector<16x1xf32> to vector<1x16x1xf32>
    %cst_20 = arith.constant dense<0.000000e+00> : vector<1xf32>
    %56 = vector.multi_reduction <add>, %55, %cst_20 [1, 2] : vector<1x16x1xf32> to vector<1xf32>
    %57 = vector.shape_cast %56 : vector<1xf32> to vector<1x1x1xf32>
    %58 = vector.extract %57[0, 0, 0] : f32 from vector<1x1x1xf32>
    %59 = arith.cmpi eq, %1, %3 : i32
    %cst_21 = arith.constant 1.000000e+00 : f32
    %cst_22 = arith.constant 2.000000e+00 : f32
    %60 = arith.select %59, %cst_21, %cst_22 : f32
    %c0_23 = arith.constant 0 : index
    %c0_24 = arith.constant 0 : index
    %61 = vector.load %arg7[%c0_23, %c0_24] : memref<8x128xf32, #tpu.memory_space<vmem>>, vector<8x128xf32>
    %62 = arith.mulf %60, %58 : f32
    %63 = vector.broadcast %62 : f32 to vector<8x128xf32>
    %64 = arith.addf %61, %63 : vector<8x128xf32>
    %c0_25 = arith.constant 0 : index
    %c0_26 = arith.constant 0 : index
    %65 = vector.load %arg7[%c0_25, %c0_26] : memref<8x128xf32, #tpu.memory_space<vmem>>, vector<8x128xf32>
    tpu.vector_store %arg7[%c0_25, %c0_26], %64 {strides = array<i32>} : memref<8x128xf32, #tpu.memory_space<vmem>>, vector<8x128xf32>,
    return
  }
  func.func @transform_0(%arg0: i32, %arg1: memref<1xi32, #tpu.memory_space<smem>>, %arg2: memref<1xi32, #tpu.memory_space<smem>>) -> (i32, i32) {
    %0 = arith.index_cast %arg0 : i32 to index
    %1 = memref.load %arg1[%0] : memref<1xi32, #tpu.memory_space<smem>>
    %c0_i32 = arith.constant 0 : i32
    %c0_i32_0 = arith.constant 0 : i32
    return %1, %c0_i32 : i32, i32
  }
  func.func @transform_1(%arg0: i32, %arg1: memref<1xi32, #tpu.memory_space<smem>>, %arg2: memref<1xi32, #tpu.memory_space<smem>>) -> (i32, i32) {
    %0 = arith.index_cast %arg0 : i32 to index
    %1 = memref.load %arg2[%0] : memref<1xi32, #tpu.memory_space<smem>>
    %c0_i32 = arith.constant 0 : i32
    %c0_i32_0 = arith.constant 0 : i32
    return %1, %c0_i32 : i32, i32
  }
  func.func @transform_2(%arg0: i32, %arg1: memref<1xi32, #tpu.memory_space<smem>>, %arg2: memref<1xi32, #tpu.memory_space<smem>>) -> (i32, i32) {
    %0 = arith.index_cast %arg0 : i32 to index
    %1 = memref.load %arg1[%0] : memref<1xi32, #tpu.memory_space<smem>>
    %c0_i32 = arith.constant 0 : i32
    %c0_i32_0 = arith.constant 0 : i32
    return %1, %c0_i32 : i32, i32
  }
  func.func @transform_3(%arg0: i32, %arg1: memref<1xi32, #tpu.memory_space<smem>>, %arg2: memref<1xi32, #tpu.memory_space<smem>>) -> (i32, i32) {
    %0 = arith.index_cast %arg0 : i32 to index
    %1 = memref.load %arg2[%0] : memref<1xi32, #tpu.memory_space<smem>>
    %c0_i32 = arith.constant 0 : i32
    %c0_i32_0 = arith.constant 0 : i32
    return %c0_i32, %1 : i32, i32
  }
  func.func @transform_4(%arg0: i32, %arg1: memref<1xi32, #tpu.memory_space<smem>>, %arg2: memref<1xi32, #tpu.memory_space<smem>>) -> (i32, i32) {
    %c0_i32 = arith.constant 0 : i32
    %c0_i32_0 = arith.constant 0 : i32
    %c0_i32_1 = arith.constant 0 : i32
    return %c0_i32, %c0_i32_0 : i32, i32
  }
}

</mosaic_0001>

<bundles_post_ra>
// kernel: tpu_custom_call.1
= control target key start
LH: loop header
LB: loop body
LE: loop exit
PB: predicated region body
PF: predicated region fallthrough
CT: control target
= control target key end

     0   :  { %13 = vsyncpa [#allocation6], 0  ;;  %s501_s0 = inlined_call_operand.<no memory space> [shape: s32[1], index: 0, kind: input, shape index: {}]   ;;  %s502_s1 = inlined_call_operand.<no memory space> [shape: s32[1], index: 1, kind: input, shape index: {}]   ;;  %s503_s2 = inlined_call_operand.vmem [shape: f32[16,128], index: 2, kind: input, shape index: {}]   ;;  %s504_s3 = inlined_call_operand.hbm [shape: f32[16,128], index: 3, kind: input, shape index: {}]   ;;  %s505_s4 = inlined_call_operand.vmem [shape: f32[16,1], index: 4, kind: input, shape index: {}]   ;;  %s506_s5 = inlined_call_operand.vmem [shape: f32[1,16], index: 5, kind: input, shape index: {}]   ;;  %s507_s6 = inlined_call_operand.hbm [shape: f32[8,128], index: 6, kind: output, shape index: {}]  }
   0x1   :  { %14 = vsyncpa [#allocation7], 0  ;;  %s327_s23 = sshll.u32 %s502_s1, 8  ;;  %s406_s27 = smov [#allocation5]  }
   0x2   :  { %s33_s26 = scalar_lea.hbm %s504_s3, %s327_s23  ;;  %s34_s28 = sshll.u32 %s406_s27, 4  ;;  %s35_s28 = int_to_ptr.vmem [resolvable:$true] %s34_s28 }
   0x3   :  { %s356_s29 = scalar_lea.hbm %s33_s26, 256  ;;  %s358_s8 = scalar_lea.hbm %s504_s3, 256 }
   0x4   :  { %p357_p0 = scmp.ne.s32.totalorder %s33_s26, %s356_s29  ;;  %p359_p1 = scmp.lt.u32.totalorder %s33_s26, %s504_s3 }
   0x5   :  { %p360_p2 = scmp.lt.u32.totalorder %s358_s8, %s356_s29  ;;  %p362_p4 = scmp.lt.u32.totalorder %s356_s29, %s33_s26 }
   0x7   :  { %p361_p3 = por %p360_p2, %p359_p1 }
   0x9   :  { %p363_p5 = por %p362_p4, %p361_p3 }
   0xb   :  { %p364_p6 = pnand %p363_p5, %p357_p0 }
   0xd   :  { %367 = shalt.err (!%p364_p6)
}
   0xe   :  { %s368_s11 = scalar_lea.vmem %s35_s28, 256  ;;  %p373_p8 = scmp.lt.s32.totalorder %s35_s28, %s35_s28 }
   0xf   :  { %p369_p7 = scmp.ne.s32.totalorder %s35_s28, %s368_s11  ;;  %p374_p9 = scmp.lt.s32.totalorder %s368_s11, %s368_s11 }
  0x11   :  { %p375_p10 = por %p374_p9, %p373_p8 }
  0x13   :  { %p376_p11 = pnand %p375_p10, %p369_p7 }
  0x15   :  { %379 = shalt.err (!%p376_p11)
}
  0x16   :  { %s407_s12 = smov 128   ;;  %s408_s13 = smov 8  }
  0x17   :  { %40 = dma.hbm_to_vmem [thread:$0]  %s33_s26, 256, %s35_s28, [#allocation6], %s407_s12, %s407_s12, %s408_s13  }
  0x18   :  { %402 = dma.done.wait [#allocation6], 256  }
  0x19   :  { %403 = vsyncadd [#allocation6], 4294967040  ;;  %s320_s15 = sshll.u32 %s501_s0, 1  ;;  %v409_v0 = vmov 0   ;;  %v109_v1 = vld [vmem:[#allocation5] sm:$0xff]  ;;  %v110_v2 = vld [vmem:[#allocation5 + $0x8] sm:$0xff]  ;;  %v232_v21 = vlaneseq  ;;  %p279_p0 = scmp.eq.s32.totalorder %s501_s0, %s502_s1 }
  0x1a   :  { %p79_p12 = scmp.lt.s32.totalorder %s320_s15, 1  ;;  %351 = vset.pattern.permute.xlu0 %v409_v0  ;;  %v339_v4 = vpack.c.bf16 %v110_v2, %v109_v1  ;;  %p96_p13 = scmp.lt.s32.totalorder %s502_s1, 0  ;;  %v410_v37 = vmov 0.0   ;;  %vm257_vm2 = vcmask 130048   ;;  %vm266_vm7 = vcmask 7168  }
  0x1b   :  { %s326_s7 = sshll.u32 %s502_s1, 4  ;;  %v240_v22 = vand.u32 127, %v232_v21  ;;  %s325_s9 = sshll.u32 %s501_s0, 4  ;;  %v233_v50 = vshrl.u32 %v232_v21, 7 }
  0x1c   :  { %s509_s15 = smov (!%p79_p12, %s320_s15), 1  ;;  %340 = vmatprep.subr.bf16.mxu0 %v339_v4  ;;  %v241_v23 = vstv %s326_s7  ;;  %v235_v51 = vstv %s325_s9 }
  0x1d   :  { %s321_s16 = sshll.u32 %s509_s15, 3  ;;  %342 = vmatpush3.bf16.xpose.msra.mxu0 %v339_v4  ;;  %v242_v24 = vadd.s32 %v241_v23, %v240_v22  ;;  %v234_v52 = vadd.s32 8, %v233_v50  ;;  %v236_v53 = vadd.s32 %v235_v51, %v233_v50 }
  0x1e   :  { %s82_s19 = scalar_lea.vmem %s503_s2, %s321_s16  ;;  %s92_s22 = scalar_lea.vmem %s505_s4, %s321_s16 }
  0x1f   :  { %v107_v3 = vld [vmem:[%s82_s19] sm:$0xff]  ;;  %v187_v6 = vld [vmem:[%s92_s22 + $0x8] sm:$0xff]  ;;  %s97_s4 = scalar_select %p96_p13, %s502_s1, 0  ;;  %vm252_vm0 = vcmp.lt.s32.totalorder %v242_v24, 16  ;;  %vm251_vm1 = vcmp.lt.s32.totalorder %v242_v24, 8  ;;  %v237_v54 = vadd.s32 %v235_v51, %v234_v52  ;;  %vm245_vm3 = vcmp.lt.s32.totalorder %v236_v53, 16 }
  0x20   :  { %336 = vmatprep.mubr.f32.mxu0 %v107_v3  ;;  %v186_v5 = vld [vmem:[%s92_s22] sm:$0xff]  ;;  %v108_v7 = vld [vmem:[%s82_s19 + $0x8] sm:$0xff]  ;;  %v253_v38 = vsel %vm252_vm0, -0.125, %v410_v37  ;;  %vm243_vm5 = vcmp.lt.s32.totalorder %v236_v53, 8  ;;  %v247_v55 = vsel %vm245_vm3, -0.125, %v410_v37  ;;  %s411_s16 = smov [#allocation8]  }
  0x21   :  { %191 = vperm.xlu0 %351, %v186_v5   ;;  %s98_s28 = scalar_lea.vmem %s506_s5, %s97_s4  ;;  %v254_v43 = vsel %vm251_vm1, 0.125, %v253_v38  ;;  %vm246_vm4 = vcmp.lt.s32.totalorder %v237_v54, 16  ;;  %vm244_vm6 = vcmp.lt.s32.totalorder %v237_v54, 8  ;;  %v249_v57 = vsel %vm243_vm5, 0.125, %v247_v55  ;;  %s292_s17 = sshll.u32 %s411_s16, 4  ;;  %s293_s17 = int_to_ptr.vmem [resolvable:$true] %s292_s17 }
  0x22   :  { %v324_v9 = vld [vmem:[%s98_s28] ss:$0 sm:$0xff]  ;;  %v248_v56 = vsel %vm246_vm4, -0.125, %v410_v37  ;;  %s280_s14 = scalar_select %p279_p0, 1.0, 2.0 }
  0x23   :  { %v250_v59 = vsel %vm244_vm6, 0.125, %v248_v56  ;;  %s380_s18 = scalar_lea.vmem %s293_s17, 128  ;;  %p385_p2 = scmp.lt.s32.totalorder %s293_s17, %s293_s17 }
  0x24   :  { %337 = vmatmul.mubr.f32.vlgmr.msra.gmra.mrb[0].mxu0 %v108_v7  ;;  %p381_p1 = scmp.ne.s32.totalorder %s293_s17, %s380_s18  ;;  %p386_p3 = scmp.lt.s32.totalorder %s380_s18, %s380_s18 }
  0x25   :  { %196 = vperm.xlu0 %351, %v187_v6  }
  0x26   :  { %p387_p4 = por %p386_p3, %p385_p2 }
  0x28   :  { %p388_p5 = pnand %p387_p4, %p381_p1 }
  0xa0   :  { %v192_v8 = vpop.permute.xlu0 %191 }
  0xa1   :  { %v205_v12 = vadd.f32 %v324_v9, %v192_v8 }
  0xa4   :  { %v197_v10 = vpop.permute.xlu0 %196 }
  0xa5   :  { %v206_v11 = vadd.f32 %v324_v9, %v197_v10 }
  0xf7   :  { %v338_v13 = vpop.f32.mrb[0].mxu0 }
  0xf8   :  { %v208_v14 = vadd.f32 %v338_v13, %v206_v11  ;;  %v177_v15 = vpop.f32.mrb[1].mxu0 }
  0xf9   :  { %v207_v16 = vadd.f32 %v205_v12, %v177_v15 }
  0xfa   :  { %v210_v17 = vmin.f32 %v208_v14, 0.0 }
  0xfb   :  { %v209_v18 = vmin.f32 %v207_v16, 0.0 }
  0xfc   :  { %v213_v19 = vmul.f32 1.442695, %v210_v17 }
  0xfd   :  { %v211_v20 = vmul.f32 1.442695, %v209_v18 }
  0xfe   :  { %352 = vpow2.f32 %v213_v19 }
  0xff   :  { %354 = vpow2.f32 %v211_v20 }
 0x108   :  { %v353_v25 = vpop.eup %352 }
 0x109   :  { %v355_v26 = vpop.eup %354  ;;  %v216_v27 = vmul.f32 %v353_v25, %v353_v25 }
 0x10a   :  { %v215_v28 = vmul.f32 %v355_v26, %v355_v26 }
 0x10b   :  { %v218_v29 = vadd.f32 %v353_v25, %v216_v27  ;;  %v220_v30 = vmul.f32 %v216_v27, %v216_v27 }
 0x10c   :  { %v217_v31 = vadd.f32 %v355_v26, %v215_v28  ;;  %v219_v32 = vmul.f32 %v215_v28, %v215_v28 }
 0x10d   :  { %v222_v33 = vadd.f32 %v220_v30, %v218_v29  ;;  %v224_v34 = vmul.f32 %v220_v30, %v220_v30 }
 0x10e   :  { %v221_v35 = vadd.f32 %v219_v32, %v217_v31  ;;  %v223_v36 = vmul.f32 %v219_v32, %v219_v32 }
 0x10f   :  { %v226_v39 = vadd.f32 %v224_v34, %v222_v33  ;;  %v228_v40 = vmul.f32 %v224_v34, %v224_v34 }
 0x110   :  { %v225_v41 = vadd.f32 %v223_v36, %v221_v35  ;;  %v227_v42 = vmul.f32 %v223_v36, %v223_v36 }
 0x111   :  { %v230_v45 = vadd.f32 %v228_v40, %v226_v39 }
 0x112   :  { %v229_v44 = vadd.f32 %v227_v42, %v225_v41 }
 0x113   :  { %v256_v48 = vmul.f32 %v254_v43, %v230_v45 }
 0x114   :  { %v255_v46 = vmul.f32 %v254_v43, %v229_v44 }
 0x115   :  { %v261_v49 = vsel %vm257_vm2, %v256_v48, 0.0 }
 0x116   :  { %v258_v47 = vsel %vm257_vm2, %v255_v46, 0.0 }
 0x117   :  { %259 = vadd.xlane.f32.xlu1 %v258_v47 }
 0x11b   :  { %262 = vadd.xlane.f32.xlu1 %v261_v49 }
 0x1a4   :  { %v260_v58 = vpop.xlane.xlu1 %259 }
 0x1a5   :  { %v264_v60 = vmul.f32 %v260_v58, %v249_v57 }
 0x1a7   :  { %v267_v63 = vsel %vm266_vm7, %v264_v60, 0.0 }
 0x1a8   :  { %v263_v61 = vpop.xlane.xlu1 %262 }
 0x1a9   :  { %v265_v62 = vmul.f32 %v263_v61, %v250_v59 }
 0x1ab   :  { %v268_v0 = vsel %vm266_vm7, %v265_v62, 0.0 }
 0x1ac   :  { %v269_v1 = vadd.f32 %v268_v0, %v267_v63 }
 0x1ae   :  { %270 = vadd.xlane.f32.xlu0 %v269_v1 }
 0x23b   :  { %v271_v2 = vpop.xlane.xlu0 %270 }
 0x23c   :  { %v272_v3 = vrot.slane %v271_v2, 4 }
 0x23e   :  { %v273_v4 = vadd.f32 %v272_v3, %v271_v2 }
 0x240   :  { %v274_v5 = vrot.slane %v273_v4, 2 }
 0x242   :  { %v275_v6 = vadd.f32 %v274_v5, %v273_v4 }
 0x244   :  { %v276_v7 = vrot.slane %v275_v6, 1 }
 0x246   :  { %v277_v8 = vadd.f32 %v276_v7, %v275_v6 }
 0x248   :  { %343 = vpush %v277_v8 }
 0x279   :  { %s344_s3 = spop %343 }
 0x27a   :  { %s282_s15 = smul.f32 %s344_s3, %s280_s14 }
 0x27c   :  { %v283_v9 = vstv %s282_s15 }
 0x27d   :  { %285 = vst [vmem:[#allocation8] sm:$0xff] %v283_v9 }
 0x27e   :  { %391 = shalt.err (!%p388_p5)
}
 0x27f   :  { %s392_s21 = scalar_lea.hbm %s507_s6, 128 }
 0x280   :  { %p393_p6 = scmp.ne.s32.totalorder %s507_s6, %s392_s21  ;;  %p396_p7 = scmp.lt.u32.totalorder %s392_s21, %s507_s6 }
 0x282   :  { %p398_p8 = pnand %p396_p7, %p393_p6 }
 0x284   :  { %401 = shalt.err (!%p398_p8)
}
 0x285   :  { %295 = dma.vmem_to_hbm [thread:$0]  %s293_s17, 128, %s507_s6, [#allocation7]  }
 0x286   :  { %404 = dma.done.wait [#allocation7], 128  }
 0x287   :  { %405 = vsyncadd [#allocation7], 4294967168 }
 0x288   :  { %299 = vsyncpa [#allocation6], 1 }
 0x289   :  { %300 = vsyncpa [#allocation7], 1 }

</bundles_post_ra>
